<compile_context>
chip_gen: v7x
topology: tpu7x:2x2x1
jax: 0.10.0
libtpu: 0.0.40
codegen_flags: <defaults>
</compile_context>

<pallas_src>
import functools

import jax
import jax.numpy as jnp
from jax.experimental import pallas as pl
from jax.experimental.pallas import tpu as pltpu


def _round_up(n, m):
    return (n + m - 1) // m * m


# ----------------------------- Pallas kernel --------------------------------

def _fused_mlp_kernel(*refs, n_hidden, log_softmax):
    """Whole MLP in one kernel: hidden Linears + ReLU, head Linear, softmax.

    refs = (x, w0, b0, w1, b1, ..., w_head, b_head, out).  Weights/biases are
    whole-operand VMEM residents; intermediates never touch HBM.
    """
    x_ref = refs[0]
    o_ref = refs[-1]
    wb = refs[1:-1]

    h = x_ref[...].astype(jnp.float32)                     # (TB, K)
    for i in range(n_hidden):
        w = wb[2 * i][...]                                 # bf16 (in_p, out_p)
        b = wb[2 * i + 1][...]                             # f32  (1, out_p)
        h = jnp.dot(h.astype(jnp.bfloat16), w,
                    preferred_element_type=jnp.float32) + b
        h = jnp.maximum(h, 0.0)                            # ReLU (VPU)

    wf = wb[2 * n_hidden][...]
    bf = wb[2 * n_hidden + 1][...]                         # padded cols = -1e30
    z = jnp.dot(h.astype(jnp.bfloat16), wf,
                preferred_element_type=jnp.float32) + bf

    m = jnp.max(z, axis=-1, keepdims=True)
    e = jnp.exp(z - m)                                     # padded cols -> 0
    s = jnp.sum(e, axis=-1, keepdims=True)
    if log_softmax:
        out = (z - m) - jnp.log(s)
    else:
        out = e / s                                        # exact normalization
    o_ref[...] = out.astype(o_ref.dtype)


def fused_mlp(x, weights, biases, *, log_softmax):
    """Single pallas_call running the full forward MLP (lane-dense output)."""
    n_hidden = len(weights) - 1
    batch, k = x.shape
    c_pad = weights[-1].shape[1]

    # Batch tile: full batch when small (full-array block dims are always
    # legal); 256 (MXU height on v6e/v7x, multiple of 128 for v5e) otherwise.
    tb = batch if batch <= 256 else 256
    grid = (pl.cdiv(batch, tb),)

    operands = [x]
    for w, b in zip(weights, biases):
        operands.extend((w, b))

    # x / out are batch-blocked; weights & biases are whole-operand,
    # grid-invariant VMEM residents (no per-step re-DMA, no double-buffer).
    in_specs = [pl.BlockSpec((tb, k), lambda i: (i, 0))]
    in_specs += [pl.BlockSpec(memory_space=pltpu.MemorySpace.VMEM)
                 for _ in range(2 * len(weights))]
    out_specs = pl.BlockSpec((tb, c_pad), lambda i: (i, 0))

    weight_bytes = sum(int(op.size) * op.dtype.itemsize for op in operands[1:])
    act_bytes = 2 * tb * (k + c_pad) * 4       # double-buffered x / out blocks
    vmem_needed = weight_bytes + act_bytes + (2 << 20)
    # TODO(synk): tile fan_in/fan_out with a K/N grid if fc_chs outgrow VMEM.
    assert vmem_needed < 48 * 1024 * 1024, "fc_chs too large for single-block kernel"
    vmem_limit = int(min(64 << 20, max(vmem_needed, 16 << 20)))

    flops = sum(2 * batch * w.shape[0] * w.shape[1] for w in weights)
    bytes_accessed = int(x.size) * 4 + weight_bytes + batch * c_pad * 4

    kern = functools.partial(_fused_mlp_kernel, n_hidden=n_hidden,
                             log_softmax=log_softmax)
    return pl.pallas_call(
        kern,
        grid=grid,
        out_shape=jax.ShapeDtypeStruct((batch, c_pad), jnp.float32),
        in_specs=in_specs,
        out_specs=out_specs,
        compiler_params=pltpu.CompilerParams(
            dimension_semantics=("parallel",),
            vmem_limit_bytes=vmem_limit),
        cost_estimate=pl.CostEstimate(
            flops=flops,
            transcendentals=batch * c_pad,
            bytes_accessed=bytes_accessed),
    )(*operands)


# ------------------------------- JAX glue -----------------------------------

def adaptive_max_pool2d(x, out_res):
    """AdaptiveMaxPool2d(output_size=out_res) for NCHW input.

    Identity when H == W == out_res; exact window max when divisible."""
    N, C, H, W = x.shape
    if H == out_res and W == out_res:
        return x
    if H % out_res == 0 and W % out_res == 0:
        kh, kw = H // out_res, W // out_res
        return jnp.max(x.reshape(N, C, out_res, kh, out_res, kw), axis=(3, 5))
    # TODO(synk): fractional adaptive-pool bins (H % out_res != 0) not implemented.
    raise NotImplementedError("adaptive pool with non-divisible bins")


class ComplexityFeatureClassifierPallas:
    def __init__(self, input_ch, input_res, class_count, fc_chs, key):
        self.input_res = input_res
        self.input_ch = input_ch
        self.class_count = class_count
        fc_chs = list(fc_chs)
        fc_chs.insert(0, input_ch * input_res * input_res)
        self.fc_chs = fc_chs

        # nn.Linear-style uniform(-1/sqrt(fan_in), +1/sqrt(fan_in)) init.
        # Weights stored transposed as (fan_in, fan_out), zero-padded once:
        #  - rows up to the (padded) width produced by the previous layer
        #    (layer 0 keeps the natural flattened width K),
        #  - columns up to a lane-dense multiple of 128.
        # Zero padding keeps the math exact (padded activations are relu(0)=0).
        # Head-bias padding columns hold -1e30 so padded classes vanish under
        # softmax without any in-kernel masking.
        dims = list(zip(fc_chs[:-1], fc_chs[1:])) + [(fc_chs[-1], class_count)]
        self.weights = []
        self.biases = []
        in_width = fc_chs[0]
        for idx, (fan_in, fan_out) in enumerate(dims):
            key, kw, kb = jax.random.split(key, 3)
            bound = 1.0 / (fan_in ** 0.5)
            w = jax.random.uniform(kw, (fan_in, fan_out), jnp.float32,
                                   minval=-bound, maxval=bound)
            b = jax.random.uniform(kb, (1, fan_out), jnp.float32,
                                   minval=-bound, maxval=bound)
            fo_p = _round_up(fan_out, 128)
            w = jnp.pad(w, ((0, in_width - fan_in), (0, fo_p - fan_out)))
            if idx == len(dims) - 1:
                b = jnp.pad(b, ((0, 0), (0, fo_p - fan_out)),
                            constant_values=-1e30)    # finite: no -inf NaNs
            else:
                b = jnp.pad(b, ((0, 0), (0, fo_p - fan_out)))
            self.weights.append(w.astype(jnp.bfloat16))   # MXU-native width
            self.biases.append(b)                          # bias stays f32
            in_width = fo_p

        # One jitted executable per (x-shape, training): pool + flatten +
        # fused Pallas kernel + class-dim slice dispatch as a single call.
        self._fwd = jax.jit(self._forward, static_argnames=("training",))

    def _forward(self, x, weights, biases, *, training):
        x = adaptive_max_pool2d(x, self.input_res)
        batch = x.shape[0]
        x = x.reshape(batch, -1)          # == torch.flatten(x, start_dim=1)
        out = fused_mlp(x, weights, biases, log_softmax=training)
        return out[:, :self.class_count]

    def __call__(self, x, training=False):
        return self._fwd(x, tuple(self.weights), tuple(self.biases),
                         training=training)


# --------------------------------- main --------------------------------------

if __name__ == "__main__":
    key = jax.random.PRNGKey(0)
    key, kx, kp = jax.random.split(key, 3)

    batch = 2
    input_ch = 4
    input_res = 16
    class_count = 10
    fc_chs = [64, 32]

    model = ComplexityFeatureClassifierPallas(
        input_ch, input_res, class_count, fc_chs, kp)

    x = jax.random.normal(kx, (batch, input_ch, input_res, input_res),
                          dtype=jnp.float32)

    # eval mode -> softmax (matches module.eval())
    out_eval = jax.block_until_ready(model(x, training=False))
    assert out_eval.shape == (batch, class_count)
    assert bool(jnp.all(out_eval >= 0.0))
    assert jnp.allclose(jnp.sum(out_eval, axis=-1), 1.0, atol=1e-3)

    # train mode -> log_softmax (matches module.train())
    out_train = jax.block_until_ready(model(x, training=True))
    assert out_train.shape == (batch, class_count)
    assert bool(jnp.all(jnp.isfinite(out_train)))
    assert jnp.allclose(jnp.sum(jnp.exp(out_train), axis=-1), 1.0, atol=1e-3)

    print("KERNEL_OK")
</pallas_src>

<mosaic_0001>
module attributes {stable_mosaic.version = 11 : i64} {
  func.func @_fused_mlp_kernel(%arg0: i32, %arg1: memref<2x1024xf32, #tpu.memory_space<vmem>>, %arg2: memref<1024x128xbf16, #tpu.memory_space<vmem>>, %arg3: memref<1x128xf32, #tpu.memory_space<vmem>>, %arg4: memref<128x128xbf16, #tpu.memory_space<vmem>>, %arg5: memref<1x128xf32, #tpu.memory_space<vmem>>, %arg6: memref<128x128xbf16, #tpu.memory_space<vmem>>, %arg7: memref<1x128xf32, #tpu.memory_space<vmem>>, %arg8: memref<2x128xf32, #tpu.memory_space<vmem>>) attributes {dimension_semantics = [#tpu.dimension_semantics<parallel>], iteration_bounds = array<i64: 1>, scalar_prefetch = 0 : i64, scratch_operands = 0 : i64, tpu.core_type = #tpu.core_type<tc>, window_params = [{transform_indices = @transform_0, window_bounds = array<i64: 2, 1024>}, {pipeline_mode = #tpu.pipeline_mode<synchronous>, transform_indices = @transform_1, window_bounds = array<i64: 1024, 128>}, {pipeline_mode = #tpu.pipeline_mode<synchronous>, transform_indices = @transform_2, window_bounds = array<i64: 1, 128>}, {pipeline_mode = #tpu.pipeline_mode<synchronous>, transform_indices = @transform_3, window_bounds = array<i64: 128, 128>}, {pipeline_mode = #tpu.pipeline_mode<synchronous>, transform_indices = @transform_4, window_bounds = array<i64: 1, 128>}, {pipeline_mode = #tpu.pipeline_mode<synchronous>, transform_indices = @transform_5, window_bounds = array<i64: 128, 128>}, {pipeline_mode = #tpu.pipeline_mode<synchronous>, transform_indices = @transform_6, window_bounds = array<i64: 1, 128>}, {transform_indices = @transform_7, window_bounds = array<i64: 2, 128>}]} {
    %c0 = arith.constant 0 : index
    %c0_0 = arith.constant 0 : index
    %0 = vector.load %arg1[%c0, %c0_0] : memref<2x1024xf32, #tpu.memory_space<vmem>>, vector<2x1024xf32>
    %c0_1 = arith.constant 0 : index
    %c0_2 = arith.constant 0 : index
    %1 = vector.load %arg2[%c0_1, %c0_2] : memref<1024x128xbf16, #tpu.memory_space<vmem>>, vector<1024x128xbf16>
    %c0_3 = arith.constant 0 : index
    %c0_4 = arith.constant 0 : index
    %2 = vector.load %arg3[%c0_3, %c0_4] : memref<1x128xf32, #tpu.memory_space<vmem>>, vector<1x128xf32>
    %3 = arith.truncf %0 : vector<2x1024xf32> to vector<2x1024xbf16>
    %cst = arith.constant dense<0.000000e+00> : vector<2x128xf32>
    %4 = tpu.matmul %3, %1, %cst {dimension_numbers = #tpu.dot_dimension_numbers<[1], [0], [0], [1], [0, 0, 1, 1], [], []>} : vector<2x1024xbf16>, vector<1024x128xbf16>, vector<2x128xf32> -> vector<2x128xf32>
    %5 = vector.broadcast %2 : vector<1x128xf32> to vector<2x128xf32>
    %6 = arith.addf %4, %5 : vector<2x128xf32>
    %cst_5 = arith.constant 0.000000e+00 : f32
    %7 = vector.broadcast %cst_5 : f32 to vector<2x128xf32>
    %8 = arith.maximumf %6, %7 : vector<2x128xf32>
    %c0_6 = arith.constant 0 : index
    %c0_7 = arith.constant 0 : index
    %9 = vector.load %arg4[%c0_6, %c0_7] : memref<128x128xbf16, #tpu.memory_space<vmem>>, vector<128x128xbf16>
    %c0_8 = arith.constant 0 : index
    %c0_9 = arith.constant 0 : index
    %10 = vector.load %arg5[%c0_8, %c0_9] : memref<1x128xf32, #tpu.memory_space<vmem>>, vector<1x128xf32>
    %11 = arith.truncf %8 : vector<2x128xf32> to vector<2x128xbf16>
    %cst_10 = arith.constant dense<0.000000e+00> : vector<2x128xf32>
    %12 = tpu.matmul %11, %9, %cst_10 {dimension_numbers = #tpu.dot_dimension_numbers<[1], [0], [0], [1], [0, 0, 1, 1], [], []>} : vector<2x128xbf16>, vector<128x128xbf16>, vector<2x128xf32> -> vector<2x128xf32>
    %13 = vector.broadcast %10 : vector<1x128xf32> to vector<2x128xf32>
    %14 = arith.addf %12, %13 : vector<2x128xf32>
    %cst_11 = arith.constant 0.000000e+00 : f32
    %15 = vector.broadcast %cst_11 : f32 to vector<2x128xf32>
    %16 = arith.maximumf %14, %15 : vector<2x128xf32>
    %c0_12 = arith.constant 0 : index
    %c0_13 = arith.constant 0 : index
    %17 = vector.load %arg6[%c0_12, %c0_13] : memref<128x128xbf16, #tpu.memory_space<vmem>>, vector<128x128xbf16>
    %c0_14 = arith.constant 0 : index
    %c0_15 = arith.constant 0 : index
    %18 = vector.load %arg7[%c0_14, %c0_15] : memref<1x128xf32, #tpu.memory_space<vmem>>, vector<1x128xf32>
    %19 = arith.truncf %16 : vector<2x128xf32> to vector<2x128xbf16>
    %cst_16 = arith.constant dense<0.000000e+00> : vector<2x128xf32>
    %20 = tpu.matmul %19, %17, %cst_16 {dimension_numbers = #tpu.dot_dimension_numbers<[1], [0], [0], [1], [0, 0, 1, 1], [], []>} : vector<2x128xbf16>, vector<128x128xbf16>, vector<2x128xf32> -> vector<2x128xf32>
    %21 = vector.broadcast %18 : vector<1x128xf32> to vector<2x128xf32>
    %22 = arith.addf %20, %21 : vector<2x128xf32>
    %cst_17 = arith.constant dense<0xFF800000> : vector<2xf32>
    %23 = vector.multi_reduction <maximumf>, %22, %cst_17 [1] : vector<2x128xf32> to vector<2xf32>
    %24 = vector.shape_cast %23 : vector<2xf32> to vector<2x1xf32>
    %25 = vector.broadcast %24 : vector<2x1xf32> to vector<2x128xf32>
    %26 = arith.subf %22, %25 : vector<2x128xf32>
    %27 = math.exp %26 : vector<2x128xf32>
    %cst_18 = arith.constant dense<0.000000e+00> : vector<2xf32>
    %28 = vector.multi_reduction <add>, %27, %cst_18 [1] : vector<2x128xf32> to vector<2xf32>
    %29 = vector.shape_cast %28 : vector<2xf32> to vector<2x1xf32>
    %30 = vector.broadcast %29 : vector<2x1xf32> to vector<2x128xf32>
    %31 = arith.divf %27, %30 : vector<2x128xf32>
    %c0_19 = arith.constant 0 : index
    %c0_20 = arith.constant 0 : index
    %32 = vector.load %arg8[%c0_19, %c0_20] : memref<2x128xf32, #tpu.memory_space<vmem>>, vector<2x128xf32>
    tpu.vector_store %arg8[%c0_19, %c0_20], %31 {strides = array<i32>} : memref<2x128xf32, #tpu.memory_space<vmem>>, vector<2x128xf32>,
    return
  }
  func.func @transform_0(%arg0: i32) -> (i32, i32) {
    %c0_i32 = arith.constant 0 : i32
    %c0_i32_0 = arith.constant 0 : i32
    return %arg0, %c0_i32 : i32, i32
  }
  func.func @transform_1(%arg0: i32) -> (i32, i32) {
    %c0_i32 = arith.constant 0 : i32
    %c0_i32_0 = arith.constant 0 : i32
    %c0_i32_1 = arith.constant 0 : i32
    return %c0_i32, %c0_i32_0 : i32, i32
  }
  func.func @transform_2(%arg0: i32) -> (i32, i32) {
    %c0_i32 = arith.constant 0 : i32
    %c0_i32_0 = arith.constant 0 : i32
    %c0_i32_1 = arith.constant 0 : i32
    return %c0_i32, %c0_i32_0 : i32, i32
  }
  func.func @transform_3(%arg0: i32) -> (i32, i32) {
    %c0_i32 = arith.constant 0 : i32
    %c0_i32_0 = arith.constant 0 : i32
    %c0_i32_1 = arith.constant 0 : i32
    return %c0_i32, %c0_i32_0 : i32, i32
  }
  func.func @transform_4(%arg0: i32) -> (i32, i32) {
    %c0_i32 = arith.constant 0 : i32
    %c0_i32_0 = arith.constant 0 : i32
    %c0_i32_1 = arith.constant 0 : i32
    return %c0_i32, %c0_i32_0 : i32, i32
  }
  func.func @transform_5(%arg0: i32) -> (i32, i32) {
    %c0_i32 = arith.constant 0 : i32
    %c0_i32_0 = arith.constant 0 : i32
    %c0_i32_1 = arith.constant 0 : i32
    return %c0_i32, %c0_i32_0 : i32, i32
  }
  func.func @transform_6(%arg0: i32) -> (i32, i32) {
    %c0_i32 = arith.constant 0 : i32
    %c0_i32_0 = arith.constant 0 : i32
    %c0_i32_1 = arith.constant 0 : i32
    return %c0_i32, %c0_i32_0 : i32, i32
  }
  func.func @transform_7(%arg0: i32) -> (i32, i32) {
    %c0_i32 = arith.constant 0 : i32
    %c0_i32_0 = arith.constant 0 : i32
    return %arg0, %c0_i32 : i32, i32
  }
}

</mosaic_0001>

<bundles_post_ra>
// kernel: _forward.1
= control target key start
LH: loop header
LB: loop body
LE: loop exit
PB: predicated region body
PF: predicated region fallthrough
CT: control target
= control target key end

     0   :  { %12 = vsyncpa [#allocation3], 0  ;;  %s1557_s0 = inlined_call_operand.vmem [shape: f32[2,1024], index: 0, kind: input, shape index: {}]   ;;  %s1558_s1 = inlined_call_operand.hbm [shape: bf16[1024,128], index: 1, kind: input, shape index: {}]   ;;  %s1559_s2 = inlined_call_operand.vmem [shape: f32[1,128], index: 2, kind: input, shape index: {}]   ;;  %s1560_s3 = inlined_call_operand.vmem [shape: bf16[128,128], index: 3, kind: input, shape index: {}]   ;;  %s1561_s4 = inlined_call_operand.vmem [shape: f32[1,128], index: 4, kind: input, shape index: {}]   ;;  %s1562_s5 = inlined_call_operand.vmem [shape: bf16[128,128], index: 5, kind: input, shape index: {}]   ;;  %s1563_s6 = inlined_call_operand.vmem [shape: f32[1,128], index: 6, kind: input, shape index: {}]   ;;  %s1564_s7 = inlined_call_operand.hbm [shape: f32[2,128], index: 7, kind: output, shape index: {}]  }
   0x1   :  { %13 = vsyncpa [#allocation4], 0  ;;  %s1399_s24 = smov [#allocation2]   ;;  %s1351_s28 = scalar_lea.hbm %s1558_s1, 8192 }
   0x2   :  { %s21_s25 = sshll.u32 %s1399_s24, 4  ;;  %p1352_p0 = scmp.ne.s32.totalorder %s1558_s1, %s1351_s28  ;;  %s22_s25 = int_to_ptr.vmem [resolvable:$true] %s21_s25 }
   0x3   :  { %p1355_p1 = scmp.lt.u32.totalorder %s1351_s28, %s1558_s1 }
   0x5   :  { %p1357_p2 = pnand %p1355_p1, %p1352_p0 }
   0x7   :  { %1360 = shalt.err (!%p1357_p2)
}
   0x8   :  { %s1361_s10 = scalar_lea.vmem %s22_s25, 8192  ;;  %p1366_p4 = scmp.lt.s32.totalorder %s22_s25, %s22_s25 }
   0x9   :  { %p1362_p3 = scmp.ne.s32.totalorder %s22_s25, %s1361_s10  ;;  %p1367_p5 = scmp.lt.s32.totalorder %s1361_s10, %s1361_s10 }
   0xb   :  { %p1368_p6 = por %p1367_p5, %p1366_p4 }
   0xd   :  { %p1369_p7 = pnand %p1368_p6, %p1362_p3 }
   0xf   :  { %1372 = shalt.err (!%p1369_p7)
}
  0x10   :  { %s1400_s11 = smov 64   ;;  %s1401_s12 = smov 4  }
  0x11   :  { %27 = dma.hbm_to_vmem [thread:$0]  %s1558_s1, 8192, %s22_s25, [#allocation3], %s1400_s11, %s1400_s11, %s1401_s12  }
  0x12   :  { %1395 = dma.done.wait [#allocation3], 8192  }
  0x13   :  { %1396 = vsyncadd [#allocation3], 4294959104  ;;  %v1265_v0 = vld [vmem:[#allocation2 + $0x40] sm:$0xff]   ;;  %v1269_v4 = vld [vmem:[#allocation2 + $0x48] sm:$0xff]   ;;  %v1402_v22 = vmov 1983009808   ;;  %v179_v24 = vlaneseq }
  0x14   :  { %v1266_v1 = vld [vmem:[#allocation2 + $0xc0] sm:$0xff]   ;;  %1112 = vmatprep.subr.bf16.mxu0 %v1265_v0  ;;  %v1270_v5 = vld [vmem:[#allocation2 + $0xc8] sm:$0xff]   ;;  %v1273_v8 = vld [vmem:[#allocation2 + $0x50] sm:$0xff]   ;;  %v177_v23 = vunpack.c.l.s4 %v1402_v22  ;;  %vm1404_vm0 = vmmov 0   ;;  %vm1001_vm1 = vcmask 1041408  }
  0x15   :  { %v1267_v2 = vld [vmem:[#allocation2] sm:$0xff]   ;;  %1134 = vmatprep.subr.bf16.mxu1 %v1266_v1  ;;  %v1271_v6 = vld [vmem:[#allocation2 + $0x8] sm:$0xff]   ;;  %v1274_v9 = vld [vmem:[#allocation2 + $0xd0] sm:$0xff]   ;;  %v180_v30 = vshrl.u32 %v179_v24, 7 }
  0x16   :  { %v1268_v3 = vld [vmem:[#allocation2 + $0x80] sm:$0xff]   ;;  %1113 = vmatpush3.bf16.msra.mxu0 %v1267_v2  ;;  %v1272_v7 = vld [vmem:[#allocation2 + $0x88] sm:$0xff]   ;;  %v1275_v10 = vld [vmem:[#allocation2 + $0x10] sm:$0xff]   ;;  %v178_v29 = vunpack.c.0.s8 %v177_v23 }
  0x17   :  { %1135 = vmatpush3.bf16.msra.mxu1 %v1268_v3  ;;  %1114 = vmatprep.subr.bf16.mxu0 %v1269_v4  ;;  %v1276_v11 = vld [vmem:[#allocation2 + $0x90] sm:$0xff]   ;;  %v1277_v12 = vld [vmem:[#allocation2 + $0x58] sm:$0xff]   ;;  %v1281_v16 = vld [vmem:[#allocation2 + $0x60] sm:$0xff]  }
  0x18   :  { %1136 = vmatprep.subr.bf16.mxu1 %v1270_v5  ;;  %v1278_v13 = vld [vmem:[#allocation2 + $0xd8] sm:$0xff]   ;;  %v1282_v17 = vld [vmem:[#allocation2 + $0xe0] sm:$0xff]   ;;  %v1285_v20 = vld [vmem:[#allocation2 + $0x68] sm:$0xff]   ;;  %v1458_v35 = vsub.s32 %v178_v29, %v180_v30 }
  0x19   :  { %v1279_v14 = vld [vmem:[#allocation2 + $0x18] sm:$0xff]   ;;  %v1283_v18 = vld [vmem:[#allocation2 + $0x20] sm:$0xff]   ;;  %v1286_v21 = vld [vmem:[#allocation2 + $0xe8] sm:$0xff]  }
  0x1a   :  { %1115 = vmatpush3.bf16.msra.mxu0 %v1271_v6  ;;  %v1280_v15 = vld [vmem:[#allocation2 + $0x98] sm:$0xff]   ;;  %v1284_v19 = vld [vmem:[#allocation2 + $0xa0] sm:$0xff]   ;;  %v1287_v25 = vld [vmem:[#allocation2 + $0x28] sm:$0xff]  }
  0x1b   :  { %1137 = vmatpush3.bf16.msra.mxu1 %v1272_v7  ;;  %1116 = vmatprep.subr.bf16.mxu0 %v1273_v8  ;;  %v1288_v26 = vld [vmem:[#allocation2 + $0xa8] sm:$0xff]   ;;  %v1289_v27 = vld [vmem:[#allocation2 + $0x70] sm:$0xff]   ;;  %v1293_v33 = vld [vmem:[#allocation2 + $0x78] sm:$0xff]  }
  0x1c   :  { %1138 = vmatprep.subr.bf16.mxu1 %v1274_v9  ;;  %v1290_v28 = vld [vmem:[#allocation2 + $0xf0] sm:$0xff]   ;;  %v1294_v34 = vld [vmem:[#allocation2 + $0xf8] sm:$0xff]   ;;  %v42_v38 = vld [vmem:[%s1557_s0] sm:$0xff] }
  0x1d   :  { %v1291_v31 = vld [vmem:[#allocation2 + $0x30] sm:$0xff]   ;;  %v1295_v36 = vld [vmem:[#allocation2 + $0x38] sm:$0xff]   ;;  %v182_v39 = vrot.slane %v42_v38, %v1458_v35  ;;  %v175_v40 = vcombine.high %v42_v38, %v42_v38  ;;  %v1298_v41 = vld [vmem:[#allocation2 + $0x140] sm:$0xff]  }
  0x1e   :  { %1117 = vmatpush3.bf16.msra.mxu0 %v1275_v10  ;;  %v1292_v32 = vld [vmem:[#allocation2 + $0xb0] sm:$0xff]   ;;  %v1296_v37 = vld [vmem:[#allocation2 + $0xb8] sm:$0xff]   ;;  %v1299_v42 = vld [vmem:[#allocation2 + $0x1c0] sm:$0xff]  }
  0x1f   :  { %1139 = vmatpush3.bf16.msra.mxu1 %v1276_v11  ;;  %1118 = vmatprep.subr.bf16.mxu0 %v1277_v12  ;;  %v190_v43 = vcombine.high %v182_v39, %v182_v39  ;;  %v189_v44 = vrot.slane %v175_v40, %v1458_v35  ;;  %v217_v45 = vpack.c.bf16 %v182_v39, %v182_v39  ;;  %v1300_v46 = vld [vmem:[#allocation2 + $0x100] sm:$0xff]   ;;  %v1302_v51 = vld [vmem:[#allocation2 + $0x148] sm:$0xff]   ;;  %v1306_v56 = vld [vmem:[#allocation2 + $0x150] sm:$0xff]  }
  0x20   :  { %1140 = vmatprep.subr.bf16.mxu1 %v1278_v13  ;;  %v1301_v49 = vld [vmem:[#allocation2 + $0x180] sm:$0xff]   ;;  %v1303_v53 = vld [vmem:[#allocation2 + $0x1c8] sm:$0xff]   ;;  %v1307_v57 = vld [vmem:[#allocation2 + $0x1d0] sm:$0xff]  }
  0x21   :  { %v218_v47 = vpack.c.bf16 %v190_v43, %v190_v43  ;;  %v191_v48 = vcombine.high %v189_v44, %v189_v44  ;;  %v219_v50 = vpack.c.bf16 %v189_v44, %v189_v44  ;;  %v1304_v54 = vld [vmem:[#allocation2 + $0x108] sm:$0xff]   ;;  %v1308_v58 = vld [vmem:[#allocation2 + $0x110] sm:$0xff]   ;;  %v1310_v60 = vld [vmem:[#allocation2 + $0x158] sm:$0xff]  }
  0x22   :  { %1119 = vmatpush3.bf16.msra.mxu0 %v1279_v14  ;;  %v1305_v55 = vld [vmem:[#allocation2 + $0x188] sm:$0xff]   ;;  %v1309_v59 = vld [vmem:[#allocation2 + $0x190] sm:$0xff]   ;;  %v1311_v61 = vld [vmem:[#allocation2 + $0x1d8] sm:$0xff]  }
  0x23   :  { %1141 = vmatpush3.bf16.msra.mxu1 %v1280_v15  ;;  %1120 = vmatprep.subr.bf16.mxu0 %v1281_v16  ;;  %v220_v52 = vpack.c.bf16 %v191_v48, %v191_v48  ;;  %v1312_v62 = vld [vmem:[#allocation2 + $0x118] sm:$0xff]   ;;  %v1314_v0 = vld [vmem:[#allocation2 + $0x160] sm:$0xff]   ;;  %v1318_v4 = vld [vmem:[#allocation2 + $0x168] sm:$0xff]  }
  0x24   :  { %1142 = vmatprep.subr.bf16.mxu1 %v1282_v17  ;;  %647 = vmatprep.mubr.bf16.mxu0 %v218_v47  ;;  %v1313_v63 = vld [vmem:[#allocation2 + $0x198] sm:$0xff]   ;;  %v1315_v1 = vld [vmem:[#allocation2 + $0x1e0] sm:$0xff]   ;;  %v1319_v5 = vld [vmem:[#allocation2 + $0x1e8] sm:$0xff]  }
  0x25   :  { %687 = vmatprep.mubr.bf16.mxu1 %v220_v52  ;;  %v1316_v2 = vld [vmem:[#allocation2 + $0x120] sm:$0xff]   ;;  %v1320_v6 = vld [vmem:[#allocation2 + $0x128] sm:$0xff]   ;;  %v1322_v8 = vld [vmem:[#allocation2 + $0x170] sm:$0xff]  }
  0x26   :  { %1121 = vmatpush3.bf16.msra.mxu0 %v1283_v18  ;;  %v1317_v3 = vld [vmem:[#allocation2 + $0x1a0] sm:$0xff]   ;;  %v1321_v7 = vld [vmem:[#allocation2 + $0x1a8] sm:$0xff]   ;;  %v1323_v9 = vld [vmem:[#allocation2 + $0x1f0] sm:$0xff]  }
  0x27   :  { %1143 = vmatpush3.bf16.msra.mxu1 %v1284_v19  ;;  %1122 = vmatprep.subr.bf16.mxu0 %v1285_v20  ;;  %v1324_v10 = vld [vmem:[#allocation2 + $0x130] sm:$0xff]   ;;  %v1326_v12 = vld [vmem:[#allocation2 + $0x178] sm:$0xff]   ;;  %v43_v15 = vld [vmem:[%s1557_s0 + $0x8] sm:$0xff] }
  0x28   :  { %1144 = vmatprep.subr.bf16.mxu1 %v1286_v21  ;;  %v1325_v11 = vld [vmem:[#allocation2 + $0x1b0] sm:$0xff]   ;;  %v1327_v13 = vld [vmem:[#allocation2 + $0x1f8] sm:$0xff]   ;;  %v199_v17 = vrot.slane %v43_v15, %v1458_v35  ;;  %v192_v18 = vcombine.high %v43_v15, %v43_v15  ;;  %v1343_v39 = vld [vmem:[%s1562_s5 + $0x20] sm:$0xff]  }
  0x29   :  { %v1328_v14 = vld [vmem:[#allocation2 + $0x138] sm:$0xff]   ;;  %v1333_v29 = vld [vmem:[%s1560_s3 + $0x10] sm:$0xff]   ;;  %v1344_v40 = vld [vmem:[%s1562_s5 + $0x28] sm:$0xff]  }
  0x2a   :  { %1123 = vmatpush3.bf16.msra.mxu0 %v1287_v25  ;;  %v1329_v16 = vld [vmem:[#allocation2 + $0x1b8] sm:$0xff]   ;;  %v207_v19 = vcombine.high %v199_v17, %v199_v17  ;;  %v206_v20 = vrot.slane %v192_v18, %v1458_v35  ;;  %v221_v21 = vpack.c.bf16 %v199_v17, %v199_v17  ;;  %v1339_v35 = vld [vmem:[%s1562_s5] sm:$0xff]  }
  0x2b   :  { %1145 = vmatpush3.bf16.msra.mxu1 %v1288_v26  ;;  %1124 = vmatprep.subr.bf16.mxu0 %v1289_v27  ;;  %v1331_v26 = vld [vmem:[%s1560_s3] sm:$0xff]   ;;  %v1403_v27 = vmov 0.0   ;;  %v1334_v30 = vld [vmem:[%s1560_s3 + $0x18] sm:$0xff]  }
  0x2c   :  { %1146 = vmatprep.subr.bf16.mxu1 %v1290_v28  ;;  %v222_v22 = vpack.c.bf16 %v207_v19, %v207_v19  ;;  %v208_v23 = vcombine.high %v206_v20, %v206_v20  ;;  %v223_v24 = vpack.c.bf16 %v206_v20, %v206_v20  ;;  %v1332_v28 = vld [vmem:[%s1560_s3 + $0x8] sm:$0xff]   ;;  %v1342_v38 = vld [vmem:[%s1562_s5 + $0x18] sm:$0xff]  }
  0x2e   :  { %1125 = vmatpush3.bf16.msra.mxu0 %v1291_v31  ;;  %v224_v25 = vpack.c.bf16 %v208_v23, %v208_v23  ;;  %v1335_v31 = vld [vmem:[%s1560_s3 + $0x20] sm:$0xff]  }
  0x2f   :  { %1147 = vmatpush3.bf16.msra.mxu1 %v1292_v32  ;;  %1126 = vmatprep.subr.bf16.mxu0 %v1293_v33  ;;  %v1336_v32 = vld [vmem:[%s1560_s3 + $0x28] sm:$0xff]   ;;  %v1337_v33 = vld [vmem:[%s1560_s3 + $0x30] sm:$0xff]  }
  0x30   :  { %1148 = vmatprep.subr.bf16.mxu1 %v1294_v34  ;;  %v1338_v34 = vld [vmem:[%s1560_s3 + $0x38] sm:$0xff]  }
  0x32   :  { %1127 = vmatpush3.bf16.msra.mxu0 %v1295_v36  ;;  %v1340_v36 = vld [vmem:[%s1562_s5 + $0x8] sm:$0xff]  }
  0x33   :  { %1149 = vmatpush3.bf16.msra.mxu1 %v1296_v37  ;;  %1156 = vmatprep.subr.bf16.mxu0 %v1298_v41  ;;  %v1341_v37 = vld [vmem:[%s1562_s5 + $0x10] sm:$0xff]  }
  0x34   :  { %1178 = vmatprep.subr.bf16.mxu1 %v1299_v42  ;;  %v1029_v42 = vld [vmem:[%s1559_s2] ss:$0 sm:$0xff] }
  0x35   :  { %648 = vmatmul.mubr.bf16.vlgmr.msra.gmra.mrb[0].mxu0 %v217_v45 }
  0x36   :  { %1157 = vmatpush3.bf16.msra.mxu0 %v1300_v46  ;;  %688 = vmatmul.mubr.bf16.vlgmr.msra.gmra.mrb[0].mxu1 %v219_v50 }
  0x37   :  { %1158 = vmatprep.subr.bf16.mxu0 %v1302_v51  ;;  %1179 = vmatpush3.bf16.msra.mxu1 %v1301_v49 }
  0x38   :  { %1180 = vmatprep.subr.bf16.mxu1 %v1303_v53  ;;  %727 = vmatprep.mubr.bf16.mxu0 %v222_v22 }
  0x39   :  { %767 = vmatprep.mubr.bf16.mxu1 %v224_v25 }
  0x3a   :  { %1159 = vmatpush3.bf16.msra.mxu0 %v1304_v54 }
  0x3b   :  { %1160 = vmatprep.subr.bf16.mxu0 %v1306_v56  ;;  %1181 = vmatpush3.bf16.msra.mxu1 %v1305_v55 }
  0x3c   :  { %1182 = vmatprep.subr.bf16.mxu1 %v1307_v57 }
  0x3e   :  { %1161 = vmatpush3.bf16.msra.mxu0 %v1308_v58 }
  0x3f   :  { %1162 = vmatprep.subr.bf16.mxu0 %v1310_v60  ;;  %1183 = vmatpush3.bf16.msra.mxu1 %v1309_v59 }
  0x40   :  { %1184 = vmatprep.subr.bf16.mxu1 %v1311_v61 }
  0x42   :  { %1163 = vmatpush3.bf16.msra.mxu0 %v1312_v62 }
  0x43   :  { %1164 = vmatprep.subr.bf16.mxu0 %v1314_v0  ;;  %1185 = vmatpush3.bf16.msra.mxu1 %v1313_v63 }
  0x44   :  { %1186 = vmatprep.subr.bf16.mxu1 %v1315_v1 }
  0x46   :  { %1165 = vmatpush3.bf16.msra.mxu0 %v1316_v2 }
  0x47   :  { %1166 = vmatprep.subr.bf16.mxu0 %v1318_v4  ;;  %1187 = vmatpush3.bf16.msra.mxu1 %v1317_v3  ;;  %v1345_v4 = vld [vmem:[%s1562_s5 + $0x30] sm:$0xff]  }
  0x48   :  { %1188 = vmatprep.subr.bf16.mxu1 %v1319_v5  ;;  %v1346_v5 = vld [vmem:[%s1562_s5 + $0x38] sm:$0xff]  }
  0x4a   :  { %1167 = vmatpush3.bf16.msra.mxu0 %v1320_v6  ;;  %v1094_v6 = vld [vmem:[%s1561_s4] ss:$0 sm:$0xff]  ;;  %s1405_s4 = smov [#allocation5]  }
  0x4b   :  { %1168 = vmatprep.subr.bf16.mxu0 %v1322_v8  ;;  %1189 = vmatpush3.bf16.msra.mxu1 %v1321_v7  ;;  %s1020_s5 = sshll.u32 %s1405_s4, 4  ;;  %s1021_s5 = int_to_ptr.vmem [resolvable:$true] %s1020_s5 }
  0x4c   :  { %1190 = vmatprep.subr.bf16.mxu1 %v1323_v9  ;;  %p1378_p9 = scmp.lt.s32.totalorder %s1021_s5, %s1021_s5 }
  0x4e   :  { %1169 = vmatpush3.bf16.msra.mxu0 %v1324_v10 }
  0x4f   :  { %1170 = vmatprep.subr.bf16.mxu0 %v1326_v12  ;;  %1191 = vmatpush3.bf16.msra.mxu1 %v1325_v11 }
  0x50   :  { %1192 = vmatprep.subr.bf16.mxu1 %v1327_v13 }
  0x52   :  { %1171 = vmatpush3.bf16.msra.mxu0 %v1328_v14  ;;  %v1103_v14 = vld [vmem:[%s1563_s6] ss:$0 sm:$0xff]  ;;  %s1373_s6 = scalar_lea.vmem %s1021_s5, 32 }
  0x53   :  { %1193 = vmatpush3.bf16.msra.mxu1 %v1329_v16  ;;  %1218 = vmatprep.subr.bf16.mxu0 %v1403_v27  ;;  %p1374_p8 = scmp.ne.s32.totalorder %s1021_s5, %s1373_s6  ;;  %p1379_p10 = scmp.lt.s32.totalorder %s1373_s6, %s1373_s6 }
  0x54   :  { %1238 = vmatprep.subr.bf16.mxu1 %v1403_v27 }
  0x55   :  { %728 = vmatmul.mubr.bf16.vlgmr.msra.gmra.mrb[4].mxu0 %v221_v21  ;;  %p1380_p11 = por %p1379_p10, %p1378_p9 }
  0x56   :  { %768 = vmatmul.mubr.bf16.vlgmr.msra.gmra.mrb[4].mxu1 %v223_v24  ;;  %1219 = vmatpush3.bf16.msra.mxu0 %v1331_v26 }
  0x57   :  { %1220 = vmatprep.subr.bf16.mxu0 %v1403_v27  ;;  %1234 = vmatprep.mubr.msk.bf16.mxu0 %vm1404_vm0, %v1403_v27  ;;  %p1381_p12 = pnand %p1380_p11, %p1374_p8 }
  0x58   :  { %1254 = vmatprep.mubr.msk.bf16.mxu1 %vm1404_vm0, %v1403_v27  ;;  %1239 = vmatpush3.bf16.msra.mxu1 %v1339_v35 }
  0x59   :  { %1240 = vmatprep.subr.bf16.mxu1 %v1403_v27 }
  0x5a   :  { %1221 = vmatpush3.bf16.msra.mxu0 %v1332_v28 }
  0x5b   :  { %1222 = vmatprep.subr.bf16.mxu0 %v1403_v27 }
  0x5c   :  { %1241 = vmatpush3.bf16.msra.mxu1 %v1340_v36 }
  0x5d   :  { %1242 = vmatprep.subr.bf16.mxu1 %v1403_v27 }
  0x5e   :  { %1223 = vmatpush3.bf16.msra.mxu0 %v1333_v29 }
  0x5f   :  { %1224 = vmatprep.subr.bf16.mxu0 %v1403_v27 }
  0x60   :  { %1243 = vmatpush3.bf16.msra.mxu1 %v1341_v37 }
  0x61   :  { %1244 = vmatprep.subr.bf16.mxu1 %v1403_v27 }
  0x62   :  { %1225 = vmatpush3.bf16.msra.mxu0 %v1334_v30 }
  0x63   :  { %1226 = vmatprep.subr.bf16.mxu0 %v1403_v27 }
  0x64   :  { %1245 = vmatpush3.bf16.msra.mxu1 %v1342_v38 }
  0x65   :  { %1246 = vmatprep.subr.bf16.mxu1 %v1403_v27 }
  0x66   :  { %1227 = vmatpush3.bf16.msra.mxu0 %v1335_v31 }
  0x67   :  { %1228 = vmatprep.subr.bf16.mxu0 %v1403_v27 }
  0x68   :  { %1247 = vmatpush3.bf16.msra.mxu1 %v1343_v39 }
  0x69   :  { %1248 = vmatprep.subr.bf16.mxu1 %v1403_v27 }
  0x6a   :  { %1229 = vmatpush3.bf16.msra.mxu0 %v1336_v32 }
  0x6b   :  { %1230 = vmatprep.subr.bf16.mxu0 %v1403_v27 }
  0x6c   :  { %1249 = vmatpush3.bf16.msra.mxu1 %v1344_v40 }
  0x6d   :  { %1250 = vmatprep.subr.bf16.mxu1 %v1403_v27 }
  0x6e   :  { %1231 = vmatpush3.bf16.msra.mxu0 %v1337_v33 }
  0x6f   :  { %1232 = vmatprep.subr.bf16.mxu0 %v1403_v27 }
  0x70   :  { %1251 = vmatpush3.bf16.msra.mxu1 %v1345_v4 }
  0x71   :  { %1252 = vmatprep.subr.bf16.mxu1 %v1403_v27 }
  0x72   :  { %1233 = vmatpush3.bf16.msra.mxu0 %v1338_v34 }
  0x74   :  { %1253 = vmatpush3.bf16.msra.mxu1 %v1346_v5 }
 0x108   :  { %v1128_v41 = vpop.f32.mrb[0].mxu0 }
 0x109   :  { %v1129_v43 = vpop.f32.mrb[1].mxu0  ;;  %v1150_v44 = vpop.f32.mrb[0].mxu1 }
 0x10a   :  { %v1130_v45 = vadd.f32 %v1129_v43, %v1128_v41  ;;  %v1131_v46 = vpop.f32.mrb[2].mxu0  ;;  %v1151_v47 = vpop.f32.mrb[1].mxu1 }
 0x10b   :  { %v1132_v48 = vpop.f32.mrb[3].mxu0  ;;  %v1152_v50 = vadd.f32 %v1151_v47, %v1150_v44  ;;  %v1153_v51 = vpop.f32.mrb[2].mxu1 }
 0x10c   :  { %v650_v49 = vadd.f32 %v1130_v45, %v1029_v42  ;;  %v1154_v52 = vpop.f32.mrb[3].mxu1 }
 0x10e   :  { %v690_v53 = vadd.f32 %v1152_v50, %v650_v49 }
 0x128   :  { %v1172_v54 = vpop.f32.mrb[4].mxu0 }
 0x129   :  { %v1173_v55 = vpop.f32.mrb[5].mxu0  ;;  %v1194_v56 = vpop.f32.mrb[4].mxu1 }
 0x12a   :  { %v1174_v57 = vadd.f32 %v1173_v55, %v1172_v54  ;;  %v1175_v58 = vpop.f32.mrb[6].mxu0  ;;  %v1195_v59 = vpop.f32.mrb[5].mxu1 }
 0x12b   :  { %v1176_v60 = vpop.f32.mrb[7].mxu0  ;;  %v1196_v62 = vadd.f32 %v1195_v59, %v1194_v56  ;;  %v1197_v63 = vpop.f32.mrb[6].mxu1 }
 0x12c   :  { %v730_v61 = vadd.f32 %v1174_v57, %v690_v53  ;;  %v1198_v0 = vpop.f32.mrb[7].mxu1 }
 0x12e   :  { %v770_v1 = vadd.f32 %v1196_v62, %v730_v61 }
 0x130   :  { %v775_v2 = vmax.f32 %v770_v1, 0.0 }
 0x132   :  { %v793_v3 = vpack.c.bf16 %v775_v2, %v775_v2 }
 0x134   :  { %1235 = vmatmul.mubr.bf16.vlgmr.msra.gmra.mrb[8].mxu0 %v793_v3 }
 0x207   :  { %v882_v7 = vpop.f32.mrb[8].mxu0 }
 0x208   :  { %v883_v8 = vadd.f32 %v1094_v6, %v882_v7  ;;  %v1236_v9 = vpop.f32.mrb[9].mxu0 }
 0x209   :  { %v885_v10 = vpop.f32.mrb[10].mxu0 }
 0x20a   :  { %v888_v11 = vmax.f32 %v883_v8, 0.0  ;;  %v1237_v12 = vpop.f32.mrb[11].mxu0 }
 0x20c   :  { %v906_v13 = vpack.c.bf16 %v888_v11, %v888_v11 }
 0x20e   :  { %1255 = vmatmul.mubr.bf16.vlgmr.msra.gmra.mrb[8].mxu1 %v906_v13 }
 0x2e1   :  { %v995_v15 = vpop.f32.mrb[8].mxu1 }
 0x2e2   :  { %v996_v16 = vadd.f32 %v1103_v14, %v995_v15  ;;  %v1256_v17 = vpop.f32.mrb[9].mxu1 }
 0x2e3   :  { %v998_v18 = vpop.f32.mrb[10].mxu1 }
 0x2e4   :  { %v1257_v19 = vpop.f32.mrb[11].mxu1  ;;  %v1002_v20 = vsel %vm1001_vm1, %v996_v16, -inf }
 0x2e5   :  { %1003 = vmax.xlane.f32.xlu0 %v1002_v20 }
 0x372   :  { %v1004_v21 = vpop.xlane.xlu0 %1003 }
 0x373   :  { %v1005_v22 = vsub.f32 %v996_v16, %v1004_v21 }
 0x375   :  { %v1006_v23 = vmul.f32 1.442695, %v1005_v22 }
 0x377   :  { %1347 = vpow2.f32 %v1006_v23 }
 0x381   :  { %v1348_v24 = vpop.eup %1347 }
 0x382   :  { %v1008_v25 = vsel %vm1001_vm1, %v1348_v24, 0.0 }
 0x383   :  { %1009 = vadd.xlane.f32.xlu0 %v1008_v25 }
 0x410   :  { %v1010_v26 = vpop.xlane.xlu0 %1009 }
 0x411   :  { %1349 = vrcp.f32 %v1010_v26 }
 0x41b   :  { %v1350_v27 = vpop.eup %1349 }
 0x41c   :  { %v1012_v28 = vmul.f32 %v1350_v27, %v1348_v24 }
 0x41e   :  { %1013 = vst [vmem:[#allocation5] sm:$0x3] %v1012_v28 }
 0x41f   :  { %1384 = shalt.err (!%p1381_p12)
}
 0x420   :  { %s1385_s30 = scalar_lea.hbm %s1564_s7, 32 }
 0x421   :  { %p1386_p13 = scmp.ne.s32.totalorder %s1564_s7, %s1385_s30  ;;  %p1389_p0 = scmp.lt.u32.totalorder %s1385_s30, %s1564_s7 }
 0x423   :  { %p1391_p1 = pnand %p1389_p0, %p1386_p13 }
 0x425   :  { %1394 = shalt.err (!%p1391_p1)
}
 0x426   :  { %1023 = dma.vmem_to_hbm [thread:$0]  %s1021_s5, 32, %s1564_s7, [#allocation4]  }
 0x427   :  { %1397 = dma.done.wait [#allocation4], 32  }
 0x428   :  { %1398 = vsyncadd [#allocation4], 4294967264 }
 0x429   :  { %1027 = vsyncpa [#allocation3], 1 }
 0x42a   :  { %1028 = vsyncpa [#allocation4], 1 }

</bundles_post_ra>
